<compile_context>
chip_gen: v7x
topology: tpu7x:2x2x1
jax: 0.10.0
libtpu: 0.0.40
codegen_flags: <defaults>
</compile_context>

<pallas_src>
import functools

import jax
import jax.numpy as jnp
from jax.experimental import pallas as pl
from jax.experimental.pallas import tpu as pltpu


# ------------------------------ configuration ------------------------------
_LANE = 128
_MIB = 1024 * 1024
_EPS = 1e-12


def _vmem_capacity_bytes() -> int:
    """Per-core VMEM capacity; conservative fallback if the query is unavailable."""
    try:
        cap = int(pltpu.get_tpu_info().vmem_capacity_bytes)
        return max(32 * _MIB, min(cap, 128 * _MIB))
    except Exception:  # not on TPU / older API -> safe-everywhere fallback
        return 64 * _MIB


_VMEM_CAP = _vmem_capacity_bytes()
_VMEM_LIMIT_BYTES = int(_VMEM_CAP * 0.85)            # ~54 MiB v7x, ~108 MiB v5e/v6e
_FUSED_LIMIT_BYTES = int(_VMEM_LIMIT_BYTES * 0.75)   # budget for (input + output) bytes
_TARGET_BLOCK_BYTES = 8 * _MIB                       # streaming block for tiled path


# ------------------------------ kernels -------------------------------------
def _make_fused_kernel(mul, offset, out_dtype):
    """Whole-tensor-in-VMEM path: reduce + normalize in one pass (1 read + 1 write)."""

    def kernel(x_ref, o_ref):
        x = x_ref[...].astype(jnp.float32)
        mn = jnp.min(x, keepdims=True)                        # (1, 1)
        mx = jnp.max(x, keepdims=True)                        # (1, 1)
        scale = mul * pl.reciprocal(jnp.maximum(mx - mn, _EPS), approx=False)
        bias = offset - mn * scale
        o_ref[...] = (x * scale + bias).astype(out_dtype)     # one mul + one add / elem

    return kernel


def _make_partial_minmax_kernel(block_rows, lanes, rows, needs_mask):
    """Tiled pass 1: per-block (8, lanes) min/max partials, pure-VPU folding.

    Ragged last block is handled with an in-kernel row mask (+inf/-inf fill),
    NOT zero padding, so the global min/max is preserved."""

    def kernel(x_ref, pmin_ref, pmax_ref):
        x = x_ref[...].astype(jnp.float32)                    # (block_rows, lanes)
        if needs_mask:
            i = pl.program_id(0)
            row_ids = jax.lax.broadcasted_iota(jnp.int32, (block_rows, 1), 0)
            valid = (i * block_rows + row_ids) < rows
            x_min = jnp.where(valid, x, jnp.inf)
            x_max = jnp.where(valid, x, -jnp.inf)
        else:
            x_min = x
            x_max = x
        # sublane-aligned fold: elementwise min/max across vregs (VPU only)
        pmin_ref[0] = jnp.min(x_min.reshape(-1, 8, lanes), axis=0)
        pmax_ref[0] = jnp.max(x_max.reshape(-1, 8, lanes), axis=0)

    return kernel


def _make_apply_kernel(out_dtype):
    """Tiled pass 2: out = x * scale + bias; scale/bias come from SMEM."""

    def kernel(stat_ref, x_ref, o_ref):
        scale = stat_ref[0]
        bias = stat_ref[1]
        o_ref[...] = (x_ref[...].astype(jnp.float32) * scale + bias).astype(out_dtype)

    return kernel


# ------------------------------ wrapper --------------------------------------
def _pick_lanes(total):
    """Pick a lane width (<= 512) that divides the element count, preferring
    folds with >= 8 rows so all sublanes are used.  Returns None if no width
    in {512, 256, 128} divides the count."""
    divisible = [l for l in (512, 256, 128) if total % l == 0]
    for l in divisible:
        if total // l >= 8:
            return l
    return divisible[0] if divisible else None


@functools.partial(jax.jit, static_argnames=("img_mode", "force_tiled"))
def val2fig(y_hat: jax.Array, img_mode: str = "L", force_tiled: bool = False) -> jax.Array:
    """Forward pass of Val2Fig on an NCHW float tensor."""
    orig_shape = y_hat.shape
    total = y_hat.size
    in_dtype = y_hat.dtype
    out_dtype = in_dtype if jnp.issubdtype(in_dtype, jnp.floating) else jnp.float32
    in_isize = jnp.dtype(in_dtype).itemsize
    out_isize = jnp.dtype(out_dtype).itemsize

    if img_mode in ("L", "RGB"):
        # ((2*(x-mn)/d - 1) + 1) * 128  ==  256 * (x - mn) / d
        mul, offset = 256.0, 0.0
    else:
        # dr.normalize only: y in [-1, 1]
        mul, offset = 2.0, -1.0

    lanes = _pick_lanes(total)
    flat = y_hat.reshape(-1)

    fused_bytes = total * (in_isize + out_isize)
    use_fused = (not force_tiled) and (fused_bytes <= _FUSED_LIMIT_BYTES)

    if use_fused:
        # ----- fused single-pass path: whole array in VMEM, no pipeline buffers -----
        x2d = flat.reshape(-1, lanes) if lanes is not None else flat.reshape(1, -1)
        out2d = pl.pallas_call(
            _make_fused_kernel(mul, offset, out_dtype),
            out_shape=jax.ShapeDtypeStruct(x2d.shape, out_dtype),
            in_specs=[pl.BlockSpec(memory_space=pltpu.MemorySpace.VMEM)],
            out_specs=pl.BlockSpec(memory_space=pltpu.MemorySpace.VMEM),
            compiler_params=pltpu.CompilerParams(vmem_limit_bytes=_VMEM_LIMIT_BYTES),
        )(x2d)
        return out2d.reshape(orig_shape)

    # ----- tiled two-pass path for large tensors -----
    padded = False
    if lanes is None:
        # Rare ragged case (element count not a multiple of 128): edge-replicate
        # pad preserves the global min/max; sliced away at the end.
        pad = (-total) % _LANE
        flat = jnp.pad(flat, (0, pad), mode="edge")
        lanes = _LANE
        padded = True
    x2d = flat.reshape(-1, lanes)
    rows = x2d.shape[0]

    itemsize = max(in_isize, out_isize)
    block_rows = max(8, (_TARGET_BLOCK_BYTES // (lanes * itemsize)) // 8 * 8)
    block_rows = min(block_rows, ((rows + 7) // 8) * 8)
    grid = pl.cdiv(rows, block_rows)
    needs_mask = (rows % block_rows) != 0   # ragged last block handled in-kernel

    x_spec = pl.BlockSpec((block_rows, lanes), lambda i: (i, 0))
    part_spec = pl.BlockSpec((1, 8, lanes), lambda i: (i, 0, 0))

    # pass 1: per-block partial min/max (megacore-friendly, tiny partial outputs)
    pmin, pmax = pl.pallas_call(
        _make_partial_minmax_kernel(block_rows, lanes, rows, needs_mask),
        out_shape=(
            jax.ShapeDtypeStruct((grid, 8, lanes), jnp.float32),
            jax.ShapeDtypeStruct((grid, 8, lanes), jnp.float32),
        ),
        grid_spec=pltpu.PrefetchScalarGridSpec(
            num_scalar_prefetch=0,
            grid=(grid,),
            in_specs=[x_spec],
            out_specs=(part_spec, part_spec),
        ),
        compiler_params=pltpu.CompilerParams(
            dimension_semantics=("parallel",),
            vmem_limit_bytes=_VMEM_LIMIT_BYTES,
        ),
    )(x2d)

    # tiny reductions + scalar prep outside the kernel (fused by XLA under jit)
    mn = jnp.min(pmin)
    mx = jnp.max(pmax)
    scale = mul / jnp.maximum(mx - mn, _EPS)
    bias = offset - mn * scale
    stats = jnp.stack([scale, bias]).astype(jnp.float32)      # (2,) -> SMEM

    # pass 2: lane-dense elementwise normalize + map to pixel range
    out2d = pl.pallas_call(
        _make_apply_kernel(out_dtype),
        out_shape=jax.ShapeDtypeStruct(x2d.shape, out_dtype),
        grid_spec=pltpu.PrefetchScalarGridSpec(
            num_scalar_prefetch=0,
            grid=(grid,),
            in_specs=[
                pl.BlockSpec(memory_space=pltpu.MemorySpace.SMEM),  # stats
                x_spec,
            ],
            out_specs=x_spec,
        ),
        compiler_params=pltpu.CompilerParams(
            dimension_semantics=("parallel",),
            vmem_limit_bytes=_VMEM_LIMIT_BYTES,
        ),
    )(stats, x2d)

    if padded:
        return out2d.reshape(-1)[:total].reshape(orig_shape)
    return out2d.reshape(orig_shape)


# ------------------------------ reference & test -----------------------------
def _reference(y_hat, img_mode="L"):
    mn = jnp.min(y_hat)
    mx = jnp.max(y_hat)
    y = 2.0 * (y_hat - mn) / jnp.maximum(mx - mn, _EPS) - 1.0
    if img_mode in ("L", "RGB"):
        return (y + 1.0) * 128.0
    return y


if __name__ == "__main__":
    key = jax.random.PRNGKey(0)
    # small NCHW input consistent with an image-valued feature map
    x = jax.random.normal(key, (2, 4, 16, 16), dtype=jnp.float32) * 3.0 + 1.5

    # fused (single-pass) path
    out = jax.block_until_ready(val2fig(x, img_mode="L"))
    ref = _reference(x, img_mode="L")
    assert out.shape == x.shape and out.dtype == jnp.float32
    assert jnp.allclose(out, ref, atol=1e-3, rtol=1e-4), "fused path mismatch"

    # tiled two-pass path (forced, so both code paths compile and run)
    out_t = jax.block_until_ready(val2fig(x, img_mode="L", force_tiled=True))
    assert jnp.allclose(out_t, ref, atol=1e-3, rtol=1e-4), "tiled path mismatch"

    # non-image mode returns only the normalized values
    out_n = jax.block_until_ready(val2fig(x, img_mode="F"))
    ref_n = _reference(x, img_mode="F")
    assert jnp.allclose(out_n, ref_n, atol=1e-5, rtol=1e-5), "normalize-only mismatch"

    # native bf16 input path (no up-front astype; compute in f32, store bf16)
    x_b = x.astype(jnp.bfloat16)
    out_b = jax.block_until_ready(val2fig(x_b, img_mode="L"))
    assert out_b.dtype == jnp.bfloat16
    ref_b = _reference(x_b.astype(jnp.float32), img_mode="L")
    assert jnp.allclose(out_b.astype(jnp.float32), ref_b, atol=2.0, rtol=2e-2), \
        "bf16 path mismatch"

    print("KERNEL_OK")
</pallas_src>

<mosaic_0001>
module attributes {stable_mosaic.version = 11 : i64} {
  func.func @kernel(%arg0: memref<8x256xf32, #tpu.memory_space<vmem>>, %arg1: memref<8x256xf32, #tpu.memory_space<vmem>>) attributes {dimension_semantics = [], scalar_prefetch = 0 : i64, scratch_operands = 0 : i64, tpu.core_type = #tpu.core_type<tc>} {
    %c0 = arith.constant 0 : index
    %c0_0 = arith.constant 0 : index
    %0 = vector.load %arg0[%c0, %c0_0] : memref<8x256xf32, #tpu.memory_space<vmem>>, vector<8x256xf32>
    %1 = vector.shape_cast %0 : vector<8x256xf32> to vector<1x8x256xf32>
    %cst = arith.constant dense<0x7F800000> : vector<1xf32>
    %2 = vector.multi_reduction <minimumf>, %1, %cst [1, 2] : vector<1x8x256xf32> to vector<1xf32>
    %3 = vector.shape_cast %2 : vector<1xf32> to vector<1x1x1xf32>
    %4 = vector.extract %3[0, 0, 0] : f32 from vector<1x1x1xf32>
    %5 = vector.broadcast %4 : f32 to vector<1x1xf32>
    %6 = vector.shape_cast %0 : vector<8x256xf32> to vector<1x8x256xf32>
    %cst_1 = arith.constant dense<0xFF800000> : vector<1xf32>
    %7 = vector.multi_reduction <maximumf>, %6, %cst_1 [1, 2] : vector<1x8x256xf32> to vector<1xf32>
    %8 = vector.shape_cast %7 : vector<1xf32> to vector<1x1x1xf32>
    %9 = vector.extract %8[0, 0, 0] : f32 from vector<1x1x1xf32>
    %10 = vector.broadcast %9 : f32 to vector<1x1xf32>
    %11 = arith.subf %10, %5 : vector<1x1xf32>
    %cst_2 = arith.constant 9.99999996E-13 : f32
    %12 = vector.broadcast %cst_2 : f32 to vector<1x1xf32>
    %13 = arith.maximumf %11, %12 : vector<1x1xf32>
    %14 = tpu.reciprocal %13 : vector<1x1xf32> -> vector<1x1xf32>
    %cst_3 = arith.constant 2.560000e+02 : f32
    %15 = vector.broadcast %cst_3 : f32 to vector<1x1xf32>
    %16 = arith.mulf %15, %14 : vector<1x1xf32>
    %17 = arith.mulf %5, %16 : vector<1x1xf32>
    %cst_4 = arith.constant 0.000000e+00 : f32
    %18 = vector.broadcast %cst_4 : f32 to vector<1x1xf32>
    %19 = arith.subf %18, %17 : vector<1x1xf32>
    %20 = vector.broadcast %16 : vector<1x1xf32> to vector<8x256xf32>
    %21 = arith.mulf %0, %20 : vector<8x256xf32>
    %22 = vector.broadcast %19 : vector<1x1xf32> to vector<8x256xf32>
    %23 = arith.addf %21, %22 : vector<8x256xf32>
    %c0_5 = arith.constant 0 : index
    %c0_6 = arith.constant 0 : index
    %24 = vector.load %arg1[%c0_5, %c0_6] : memref<8x256xf32, #tpu.memory_space<vmem>>, vector<8x256xf32>
    tpu.vector_store %arg1[%c0_5, %c0_6], %23 {strides = array<i32>} : memref<8x256xf32, #tpu.memory_space<vmem>>, vector<8x256xf32>,
    return
  }
}

</mosaic_0001>

<bundles_post_ra>
// kernel: val2fig.1
= control target key start
LH: loop header
LB: loop body
LE: loop exit
PB: predicated region body
PF: predicated region fallthrough
CT: control target
= control target key end

     0   :  { %s76_s0 = inlined_call_operand.vmem [shape: f32[8,256], index: 0, kind: input, shape index: {}]   ;;  %s77_s1 = inlined_call_operand.vmem [shape: f32[8,256], index: 1, kind: output, shape index: {}]  }
   0x1   :  { %v8_v0 = vld [vmem:[%s76_s0] sm:$0xff]  ;;  %v9_v1 = vld [vmem:[%s76_s0 + $0x8] sm:$0xff] }
   0x2   :  { %v10_v2 = vmin.f32 %v8_v0, %v9_v1  ;;  %v21_v3 = vmax.f32 %v8_v0, %v9_v1 }
   0x4   :  { %11 = vmin.xlane.f32.xlu0 %v10_v2 }
   0x8   :  { %22 = vmax.xlane.f32.xlu0 %v21_v3 }
  0x91   :  { %v12_v4 = vpop.xlane.xlu0 %11 }
  0x92   :  { %v13_v5 = vrot.slane %v12_v4, 4 }
  0x94   :  { %v14_v6 = vmin.f32 %v12_v4, %v13_v5 }
  0x95   :  { %v23_v7 = vpop.xlane.xlu0 %22 }
  0x96   :  { %v15_v8 = vrot.slane %v14_v6, 2  ;;  %v24_v9 = vrot.slane %v23_v7, 4 }
  0x98   :  { %v25_v10 = vmax.f32 %v23_v7, %v24_v9  ;;  %v16_v11 = vmin.f32 %v14_v6, %v15_v8 }
  0x9a   :  { %v26_v12 = vrot.slane %v25_v10, 2  ;;  %v17_v13 = vrot.slane %v16_v11, 1 }
  0x9c   :  { %v27_v14 = vmax.f32 %v25_v10, %v26_v12  ;;  %v18_v15 = vmin.f32 %v16_v11, %v17_v13 }
  0x9e   :  { %48 = vpush %v18_v15  ;;  %v28_v16 = vrot.slane %v27_v14, 1 }
  0xa0   :  { %v29_v17 = vmax.f32 %v27_v14, %v28_v16 }
  0xa2   :  { %50 = vpush %v29_v17 }
  0xcf   :  { %s49_s0 = spop %48 }
  0xd0   :  { %v20_v18 = vstv %s49_s0 }
  0xd3   :  { %s51_s10 = spop %50 }
  0xd4   :  { %v31_v19 = vstv %s51_s10 }
  0xd5   :  { %v32_v20 = vsub.f32 %v31_v19, %v20_v18 }
  0xd7   :  { %v33_v21 = vmax.f32 %v32_v20, 1e-12 }
  0xd9   :  { %52 = vrcp.f32 %v33_v21 }
  0xe3   :  { %v53_v22 = vpop.eup %52 }
  0xe4   :  { %v35_v23 = vmul.f32 256.0, %v53_v22 }
  0xe6   :  { %v36_v24 = vmul.f32 %v35_v23, %v20_v18  ;;  %v38_v26 = vmul.f32 %v35_v23, %v8_v0  ;;  %v39_v27 = vmul.f32 %v35_v23, %v9_v1 }
  0xe8   :  { %v37_v25 = vsub.f32 0.0, %v36_v24 }
  0xea   :  { %v40_v28 = vadd.f32 %v38_v26, %v37_v25  ;;  %v41_v29 = vadd.f32 %v39_v27, %v37_v25 }
  0xec   :  { %42 = vst [vmem:[%s77_s1] sm:$0xff] %v40_v28  ;;  %43 = vst [vmem:[%s77_s1 + $0x8] sm:$0xff] %v41_v29 }

</bundles_post_ra>
